<compile_context>
chip_gen: v7x
topology: tpu7x:2x2x1
jax: 0.10.0
libtpu: 0.0.40
codegen_flags: <defaults>
</compile_context>

<pallas_src>
import functools

import jax
import jax.numpy as jnp
from jax import lax
from jax.experimental import pallas as pl
from jax.experimental.pallas import tpu as pltpu


def _cdiv(a, b):
    return (a + b - 1) // b


def _round_up(a, b):
    return _cdiv(a, b) * b


def _linear_bias_kernel(x_ref, w_ref, b_ref, o_ref, acc_ref):
    # x_ref : (tb, tk)   input tile
    # w_ref : (tn, tk)   weight tile, PyTorch (out, in) layout
    # b_ref : (1,  tn)   bias tile
    # o_ref : (tb, tn)   output tile
    # acc_ref: (tb, tn)  f32 accumulator, resident across the K grid axis
    k = pl.program_id(2)

    @pl.when(k == 0)
    def _():
        acc_ref[...] = jnp.zeros_like(acc_ref)

    # Contract the shared C (last) dim of x and w on the MXU. This lowers to a
    # matmul with a transposed-RHS operand load (no in-kernel XLU transpose).
    acc_ref[...] += lax.dot_general(
        x_ref[...],
        w_ref[...],
        dimension_numbers=(((1,), (1,)), ((), ())),
        preferred_element_type=jnp.float32,
    )

    @pl.when(k == pl.num_programs(2) - 1)
    def _():
        o_ref[...] = (acc_ref[...] + b_ref[...].astype(jnp.float32)).astype(o_ref.dtype)


def _linear_nobias_kernel(x_ref, w_ref, o_ref, acc_ref):
    k = pl.program_id(2)

    @pl.when(k == 0)
    def _():
        acc_ref[...] = jnp.zeros_like(acc_ref)

    acc_ref[...] += lax.dot_general(
        x_ref[...],
        w_ref[...],
        dimension_numbers=(((1,), (1,)), ((), ())),
        preferred_element_type=jnp.float32,
    )

    @pl.when(k == pl.num_programs(2) - 1)
    def _():
        o_ref[...] = acc_ref[...].astype(o_ref.dtype)


def _tpu_vmem_capacity():
    # Physical VMEM: 128 MiB on v5e/v6e, 64 MiB per TensorCore on v7x.
    try:
        return int(pltpu.get_tpu_info().vmem_capacity_bytes)
    except Exception:
        return 64 * 1024 * 1024  # conservative (v7x-sized) fallback


def _choose_tk(C, block_k):
    """Pick the contraction tile and any K zero-padding (padding K is matmul-safe)."""
    if C <= block_k:
        return C, 0  # full extent: always a legal block shape, fits easily
    # Largest 128-multiple divisor of C not exceeding block_k -> no padding.
    for tk in range(block_k, 127, -128):
        if C % tk == 0:
            return tk, 0
    # Fallback: zero-pad C up to a 512 multiple and tile with tk=512.
    tk = 512
    return tk, _round_up(C, tk) - C


@functools.partial(jax.jit, static_argnames=("block_b", "block_n", "block_k"))
def linear_head(x, weight, bias=None, *, block_b=None, block_n=None, block_k=None):
    """y = x @ weight.T + bias   (PyTorch nn.Linear / LinearHead.forward semantics)

    x:      (B, C)
    weight: (out_features, in_features)   -- PyTorch nn.Linear convention
    bias:   (out_features,) or None
    """
    B, C = x.shape
    O, Cw = weight.shape
    assert C == Cw, "in_features mismatch between x and weight"

    vmem_cap = _tpu_vmem_capacity()
    big_vmem = vmem_cap >= 96 * 1024 * 1024  # 128 MiB parts (v5e/v6e) vs v7x (64 MiB)

    if block_b is None:
        block_b = 512                      # halves weight HBM re-reads vs 256
    if block_n is None:
        block_n = 2048 if big_vmem else 1024
    if block_k is None:
        block_k = 1024

    # Lane-dense output: pad small / misaligned O to a 128 multiple (sliced off
    # after the call). Large O that only has a partial last tile is left alone.
    O_pad = _round_up(O, 128) if (O % 128 != 0 and O <= block_n) else O

    # Contraction tiling: 128-aligned divisor of C, or zero-pad C.
    tk, pad_k = _choose_tk(C, block_k)
    C_pad = C + pad_k

    xp = x if pad_k == 0 else jnp.pad(x, ((0, 0), (0, pad_k)))
    wp = weight
    if pad_k or O_pad != O:
        wp = jnp.pad(weight, ((0, O_pad - O), (0, pad_k)))

    tb = B if B <= block_b else block_b          # full extent or 8-aligned tile
    tn = O_pad if O_pad <= block_n else block_n  # full extent or 128-aligned tile

    # Guarantee >= 2 tiles on the parallel axes so v7x's 2 TensorCores both work.
    if _cdiv(B, tb) * _cdiv(O_pad, tn) == 1:
        if O_pad >= 256:
            tn = _round_up(_cdiv(O_pad, 2), 128)     # split O (weight read once)
        elif B >= 16:
            tb = _round_up(_cdiv(B, 2), 8)           # else split B

    grid = (_cdiv(B, tb), _cdiv(O_pad, tn), _cdiv(C_pad, tk))

    # VMEM budget: double-buffered in/out tiles + f32 accumulator + headroom,
    # capped at 75% of physical VMEM (never request all of v7x's 64 MiB).
    x_it, w_it = x.dtype.itemsize, weight.dtype.itemsize
    tile_bytes = (
        2 * (tb * tk * x_it + tn * tk * w_it + tb * tn * x_it + tn * w_it)
        + tb * tn * 4
    )
    vmem_limit = int(min(max(tile_bytes * 1.25, 32 * 1024 * 1024), 0.75 * vmem_cap))

    cost = pl.CostEstimate(
        flops=2 * B * C * O,
        transcendentals=0,
        bytes_accessed=(
            B * C * grid[1] * x_it            # x is re-read once per output tile
            + O * C * grid[0] * w_it          # weight re-read once per batch tile
            + (O * w_it if bias is not None else 0)
            + B * O * x_it
        ),
    )

    x_spec = pl.BlockSpec((tb, tk), lambda i, j, k: (i, k))
    w_spec = pl.BlockSpec((tn, tk), lambda i, j, k: (j, k))
    o_spec = pl.BlockSpec((tb, tn), lambda i, j, k: (i, j))

    common = dict(
        out_shape=jax.ShapeDtypeStruct((B, O_pad), x.dtype),
        compiler_params=pltpu.CompilerParams(
            dimension_semantics=("parallel", "parallel", "arbitrary"),
            vmem_limit_bytes=vmem_limit,
        ),
        cost_estimate=cost,
    )

    if bias is None:
        out = pl.pallas_call(
            _linear_nobias_kernel,
            grid_spec=pltpu.PrefetchScalarGridSpec(
                num_scalar_prefetch=0,
                grid=grid,
                in_specs=[x_spec, w_spec],
                out_specs=o_spec,
                scratch_shapes=[pltpu.VMEM((tb, tn), jnp.float32)],
            ),
            **common,
        )(xp, wp)
    else:
        bp = bias if O_pad == O else jnp.pad(bias, (0, O_pad - O))
        b2 = bp.reshape(1, O_pad)
        b_spec = pl.BlockSpec((1, tn), lambda i, j, k: (0, j))
        out = pl.pallas_call(
            _linear_bias_kernel,
            grid_spec=pltpu.PrefetchScalarGridSpec(
                num_scalar_prefetch=0,
                grid=grid,
                in_specs=[x_spec, w_spec, b_spec],
                out_specs=o_spec,
                scratch_shapes=[pltpu.VMEM((tb, tn), jnp.float32)],
            ),
            **common,
        )(xp, wp, b2)

    return out if O_pad == O else out[:, :O]


def init_linear_params(key, in_features, out_features, dtype=jnp.float32):
    # Deterministic init mimicking nn.Linear defaults (uniform +/- 1/sqrt(fan_in)).
    kw, kb = jax.random.split(key)
    bound = 1.0 / jnp.sqrt(jnp.array(in_features, dtype=jnp.float32))
    weight = jax.random.uniform(
        kw, (out_features, in_features), dtype=dtype, minval=-bound, maxval=bound
    )
    bias = jax.random.uniform(
        kb, (out_features,), dtype=dtype, minval=-bound, maxval=bound
    )
    return weight, bias


if __name__ == "__main__":
    key = jax.random.PRNGKey(0)
    k_x, k_p, k_x2, k_p2 = jax.random.split(key, 4)

    # Case 1: tiny head (exercises O -> 128 lane padding), with bias.
    B, in_features, out_features = 8, 32, 16
    x = jax.random.normal(k_x, (B, in_features), dtype=jnp.float32)
    weight, bias = init_linear_params(k_p, in_features, out_features)

    out = jax.block_until_ready(linear_head(x, weight, bias))
    ref = x @ weight.T + bias
    assert out.shape == (B, out_features)
    assert jnp.allclose(out, ref, atol=1e-5, rtol=1e-5)

    # Case 2: bias-free variant + misaligned O (pads to 256, splits parallel grid).
    B2, C2, O2 = 16, 96, 200
    x2 = jax.random.normal(k_x2, (B2, C2), dtype=jnp.float32)
    w2, _ = init_linear_params(k_p2, C2, O2)

    out2 = jax.block_until_ready(linear_head(x2, w2, None))
    ref2 = x2 @ w2.T
    assert out2.shape == (B2, O2)
    assert jnp.allclose(out2, ref2, atol=1e-5, rtol=1e-5)

    print("KERNEL_OK")
</pallas_src>

<mosaic_0001>
module attributes {stable_mosaic.version = 11 : i64} {
  func.func @_linear_bias_kernel(%arg0: i32, %arg1: i32, %arg2: i32, %arg3: memref<8x32xf32, #tpu.memory_space<vmem>>, %arg4: memref<128x32xf32, #tpu.memory_space<vmem>>, %arg5: memref<1x128xf32, #tpu.memory_space<vmem>>, %arg6: memref<8x128xf32, #tpu.memory_space<vmem>>, %arg7: memref<8x128xf32, #tpu.memory_space<vmem>>) attributes {dimension_semantics = [#tpu.dimension_semantics<parallel>, #tpu.dimension_semantics<parallel>, #tpu.dimension_semantics<arbitrary>], iteration_bounds = array<i64: 1, 1, 1>, scalar_prefetch = 0 : i64, scratch_operands = 1 : i64, tpu.core_type = #tpu.core_type<tc>, window_params = [{transform_indices = @transform_0, window_bounds = array<i64: 8, 32>}, {transform_indices = @transform_1, window_bounds = array<i64: 128, 32>}, {transform_indices = @transform_2, window_bounds = array<i64: 1, 128>}, {transform_indices = @transform_3, window_bounds = array<i64: 8, 128>}]} {
    %c0_i32 = arith.constant 0 : i32
    %0 = arith.cmpi eq, %arg2, %c0_i32 : i32
    %1 = arith.extui %0 : i1 to i32
    %c0_i32_0 = arith.constant 0 : i32
    %2 = arith.cmpi ne, %1, %c0_i32_0 : i32
    scf.if %2 {
      %cst_10 = arith.constant 0.000000e+00 : f32
      %12 = vector.broadcast %cst_10 : f32 to vector<8x128xf32>
      %c0_11 = arith.constant 0 : index
      %c0_12 = arith.constant 0 : index
      %13 = vector.load %arg7[%c0_11, %c0_12] : memref<8x128xf32, #tpu.memory_space<vmem>>, vector<8x128xf32>
      tpu.vector_store %arg7[%c0_11, %c0_12], %12 {strides = array<i32>} : memref<8x128xf32, #tpu.memory_space<vmem>>, vector<8x128xf32>,
    } else {
    }
    %c0 = arith.constant 0 : index
    %c0_1 = arith.constant 0 : index
    %3 = vector.load %arg7[%c0, %c0_1] : memref<8x128xf32, #tpu.memory_space<vmem>>, vector<8x128xf32>
    %c0_2 = arith.constant 0 : index
    %c0_3 = arith.constant 0 : index
    %4 = vector.load %arg3[%c0_2, %c0_3] : memref<8x32xf32, #tpu.memory_space<vmem>>, vector<8x32xf32>
    %c0_4 = arith.constant 0 : index
    %c0_5 = arith.constant 0 : index
    %5 = vector.load %arg4[%c0_4, %c0_5] : memref<128x32xf32, #tpu.memory_space<vmem>>, vector<128x32xf32>
    %cst = arith.constant dense<0.000000e+00> : vector<8x128xf32>
    %6 = tpu.matmul %4, %5, %cst {dimension_numbers = #tpu.dot_dimension_numbers<[1], [1], [0], [0], [0, 0, 1, 0], [], []>} : vector<8x32xf32>, vector<128x32xf32>, vector<8x128xf32> -> vector<8x128xf32>
    %7 = arith.addf %3, %6 : vector<8x128xf32>
    %c0_6 = arith.constant 0 : index
    %c0_7 = arith.constant 0 : index
    %8 = vector.load %arg7[%c0_6, %c0_7] : memref<8x128xf32, #tpu.memory_space<vmem>>, vector<8x128xf32>
    tpu.vector_store %arg7[%c0_6, %c0_7], %7 {strides = array<i32>} : memref<8x128xf32, #tpu.memory_space<vmem>>, vector<8x128xf32>,
    %c0_i32_8 = arith.constant 0 : i32
    %9 = arith.cmpi eq, %arg2, %c0_i32_8 : i32
    %10 = arith.extui %9 : i1 to i32
    %c0_i32_9 = arith.constant 0 : i32
    %11 = arith.cmpi ne, %10, %c0_i32_9 : i32
    scf.if %11 {
      %c0_10 = arith.constant 0 : index
      %c0_11 = arith.constant 0 : index
      %12 = vector.load %arg7[%c0_10, %c0_11] : memref<8x128xf32, #tpu.memory_space<vmem>>, vector<8x128xf32>
      %c0_12 = arith.constant 0 : index
      %c0_13 = arith.constant 0 : index
      %13 = vector.load %arg5[%c0_12, %c0_13] : memref<1x128xf32, #tpu.memory_space<vmem>>, vector<1x128xf32>
      %14 = vector.broadcast %13 : vector<1x128xf32> to vector<8x128xf32>
      %15 = arith.addf %12, %14 : vector<8x128xf32>
      %c0_14 = arith.constant 0 : index
      %c0_15 = arith.constant 0 : index
      %16 = vector.load %arg6[%c0_14, %c0_15] : memref<8x128xf32, #tpu.memory_space<vmem>>, vector<8x128xf32>
      tpu.vector_store %arg6[%c0_14, %c0_15], %15 {strides = array<i32>} : memref<8x128xf32, #tpu.memory_space<vmem>>, vector<8x128xf32>,
    } else {
    }
    return
  }
  func.func @transform_0(%arg0: i32, %arg1: i32, %arg2: i32) -> (i32, i32) {
    %c0_i32 = arith.constant 0 : i32
    return %arg0, %arg2 : i32, i32
  }
  func.func @transform_1(%arg0: i32, %arg1: i32, %arg2: i32) -> (i32, i32) {
    %c0_i32 = arith.constant 0 : i32
    return %arg1, %arg2 : i32, i32
  }
  func.func @transform_2(%arg0: i32, %arg1: i32, %arg2: i32) -> (i32, i32) {
    %c0_i32 = arith.constant 0 : i32
    %c0_i32_0 = arith.constant 0 : i32
    return %c0_i32, %arg1 : i32, i32
  }
  func.func @transform_3(%arg0: i32, %arg1: i32, %arg2: i32) -> (i32, i32) {
    %c0_i32 = arith.constant 0 : i32
    return %arg0, %arg1 : i32, i32
  }
}

</mosaic_0001>

<bundles_post_ra>
// kernel: linear_head.1
= control target key start
LH: loop header
LB: loop body
LE: loop exit
PB: predicated region body
PF: predicated region fallthrough
CT: control target
= control target key end

     0   :  { %vm38_vm0 = vcmask 261120   ;;  %v319_v2 = vmov 0.0|0.0   ;;  %vm320_vm2 = vmmov 0   ;;  %v321_v5 = vmov 0.0   ;;  %s432_s0 = inlined_call_operand.vmem [shape: f32[8,32], index: 0, kind: input, shape index: {}]   ;;  %s433_s1 = inlined_call_operand.vmem [shape: f32[128,32], index: 1, kind: input, shape index: {}]   ;;  %s434_s2 = inlined_call_operand.vmem [shape: f32[1,128], index: 2, kind: input, shape index: {}]   ;;  %s435_s3 = inlined_call_operand.hbm [shape: f32[8,128], index: 3, kind: output, shape index: {}]  }
   0x1   :  { %v22_v0 = vld [vmem:[%s433_s1] sm:$0xff]  ;;  %v23_v1 = vld [vmem:[%s433_s1 + $0x8] sm:$0xff]  ;;  %259 = vmatprep.subr.bf16.mxu0 %v319_v2  ;;  %vm351_vm1 = vmpackc.low %vm38_vm0, %vm38_vm0  ;;  %256 = vmatprep.mubr.msk.f32.mxu0 %vm320_vm2, %v321_v5 }
   0x2   :  { %v260_v3 = vpack.c.bf16 %v23_v1, %v22_v0  ;;  %v24_v6 = vld [vmem:[%s433_s1 + $0x10] sm:$0xff]  ;;  %v25_v7 = vld [vmem:[%s433_s1 + $0x18] sm:$0xff] }
   0x4   :  { %262 = vmatpush3.bf16.xpose.msk.msra.mxu0 %vm351_vm1, %v260_v3 }
   0x5   :  { %263 = vmatprep.subr.bf16.mxu0 %v319_v2 }
   0x6   :  { %8 = vsyncpa [#allocation4], 0  ;;  %v264_v8 = vpack.c.bf16 %v25_v7, %v24_v6  ;;  %v26_v9 = vld [vmem:[%s433_s1 + $0x20] sm:$0xff]  ;;  %v27_v10 = vld [vmem:[%s433_s1 + $0x28] sm:$0xff]  ;;  %s322_s21 = smov [#allocation3]  }
   0x7   :  { %v268_v11 = vpack.c.bf16 %v27_v10, %v26_v9  ;;  %v28_v12 = vld [vmem:[%s433_s1 + $0x30] sm:$0xff]  ;;  %v29_v13 = vld [vmem:[%s433_s1 + $0x38] sm:$0xff]  ;;  %v30_v15 = vld [vmem:[%s433_s1 + $0x40] sm:$0xff]  ;;  %s181_s22 = sshll.u32 %s322_s21, 4  ;;  %s182_s22 = int_to_ptr.vmem [resolvable:$true] %s181_s22 }
   0x8   :  { %v272_v14 = vpack.c.bf16 %v29_v13, %v28_v12  ;;  %v31_v16 = vld [vmem:[%s433_s1 + $0x48] sm:$0xff]  ;;  %v32_v18 = vld [vmem:[%s433_s1 + $0x50] sm:$0xff]  ;;  %v33_v19 = vld [vmem:[%s433_s1 + $0x58] sm:$0xff]  ;;  %p300_p1 = scmp.lt.s32.totalorder %s182_s22, %s182_s22 }
   0x9   :  { %v276_v17 = vpack.c.bf16 %v31_v16, %v30_v15  ;;  %v280_v20 = vpack.c.bf16 %v33_v19, %v32_v18  ;;  %v34_v21 = vld [vmem:[%s433_s1 + $0x60] sm:$0xff]  ;;  %v35_v22 = vld [vmem:[%s433_s1 + $0x68] sm:$0xff]  ;;  %v36_v24 = vld [vmem:[%s433_s1 + $0x70] sm:$0xff] }
   0xa   :  { %v284_v23 = vpack.c.bf16 %v35_v22, %v34_v21  ;;  %v37_v25 = vld [vmem:[%s433_s1 + $0x78] sm:$0xff]  ;;  %v21_v27 = vld [vmem:[%s432_s0] sm:$0xff]  ;;  %s295_s1 = scalar_lea.vmem %s182_s22, 128 }
   0xb   :  { %v288_v26 = vpack.c.bf16 %v37_v25, %v36_v24  ;;  %v206_v28 = vld [vmem:[%s434_s2] ss:$0 sm:$0xff]  ;;  %p296_p0 = scmp.ne.s32.totalorder %s182_s22, %s295_s1  ;;  %p301_p2 = scmp.lt.s32.totalorder %s295_s1, %s295_s1 }
   0xc   :  { %266 = vmatpush3.bf16.xpose.msk.msra.mxu0 %vm351_vm1, %v264_v8 }
   0xd   :  { %267 = vmatprep.subr.bf16.mxu0 %v319_v2  ;;  %p302_p3 = por %p301_p2, %p300_p1 }
   0xf   :  { %p303_p4 = pnand %p302_p3, %p296_p0 }
  0x14   :  { %270 = vmatpush3.bf16.xpose.msk.msra.mxu0 %vm351_vm1, %v268_v11 }
  0x15   :  { %271 = vmatprep.subr.bf16.mxu0 %v319_v2 }
  0x1c   :  { %274 = vmatpush3.bf16.xpose.msk.msra.mxu0 %vm351_vm1, %v272_v14 }
  0x1d   :  { %275 = vmatprep.subr.bf16.mxu0 %v319_v2 }
  0x24   :  { %278 = vmatpush3.bf16.xpose.msk.msra.mxu0 %vm351_vm1, %v276_v17 }
  0x25   :  { %279 = vmatprep.subr.bf16.mxu0 %v319_v2 }
  0x2c   :  { %282 = vmatpush3.bf16.xpose.msk.msra.mxu0 %vm351_vm1, %v280_v20 }
  0x2d   :  { %283 = vmatprep.subr.bf16.mxu0 %v319_v2 }
  0x34   :  { %286 = vmatpush3.bf16.xpose.msk.msra.mxu0 %vm351_vm1, %v284_v23 }
  0x35   :  { %287 = vmatprep.subr.bf16.mxu0 %v319_v2 }
  0x3c   :  { %290 = vmatpush3.bf16.xpose.msk.msra.mxu0 %vm351_vm1, %v288_v26 }
  0x43   :  { %257 = vmatmul.mubr.msk.f32.vlgmr.msra.gmra.mrb[0].mxu0 %vm38_vm0, %v21_v27 }
 0x116   :  { %v156_v29 = vpop.f32.mrb[0].mxu0 }
 0x117   :  { %v173_v30 = vadd.f32 %v206_v28, %v156_v29  ;;  %v258_v31 = vpop.f32.mrb[1].mxu0 }
 0x119   :  { %174 = vst [vmem:[#allocation3] sm:$0xff] %v173_v30 }
 0x11a   :  { %306 = shalt.err (!%p303_p4)
}
 0x11b   :  { %s307_s24 = scalar_lea.hbm %s435_s3, 128 }
 0x11c   :  { %p308_p5 = scmp.ne.s32.totalorder %s435_s3, %s307_s24  ;;  %p311_p6 = scmp.lt.u32.totalorder %s307_s24, %s435_s3 }
 0x11e   :  { %p313_p7 = pnand %p311_p6, %p308_p5 }
 0x120   :  { %316 = shalt.err (!%p313_p7)
}
 0x121   :  { %184 = dma.vmem_to_hbm [thread:$0]  %s182_s22, 128, %s435_s3, [#allocation4]  }
 0x122   :  { %317 = dma.done.wait [#allocation4], 128  }
 0x123   :  { %318 = vsyncadd [#allocation4], 4294967168 }
 0x124   :  { %188 = vsyncpa [#allocation4], 1 }

</bundles_post_ra>
